<compile_context>
chip_gen: v7x
topology: tpu7x:2x2x1
jax: 0.10.0
libtpu: 0.0.40
codegen_flags: <defaults>
</compile_context>

<pallas_src>
import functools

import jax
import jax.numpy as jnp
from jax.experimental import pallas as pl
from jax.experimental.pallas import tpu as pltpu

GAMMA = 0.95  # self.gamma in DialogExchanger.__init__


def _pack_tokens_kernel(tok_ref, thr_ref, out_ref, *, cl_pad):
    """Zero out token positions past each row's context / output length.

    tok_ref : (TB, W) int32, W = CLp + Lop, contexts in [0, CLp), outputs in
              [CLp, CLp + Lop).
    thr_ref : (TB, 2) int32, col 0 = ctx_len * utt_len, col 1 = CLp + out_len.
    """
    tb, w = tok_ref.shape
    thr = thr_ref[...]
    ctx_thr = thr[:, 0:1]                     # (TB, 1)
    out_thr = thr[:, 1:2]                     # (TB, 1)
    lane = jax.lax.broadcasted_iota(jnp.int32, (tb, w), 1)
    row_thr = jnp.where(lane < cl_pad, ctx_thr, out_thr)
    # Single full-ref, lane-dense store (unmasked vst).
    out_ref[...] = jnp.where(lane < row_thr, tok_ref[...], 0)


def _round_up(x, m):
    return -(-x // m) * m


def _pick_block_b(b, row_bytes, budget_bytes=12 * 1024 * 1024):
    """Rows per grid step: largest multiple of 8 that fits the double-buffered
    VMEM budget, capped so the grid keeps >= 2 steps (~8 for large batches)
    for DMA pipelining and the v7x megacore split."""
    tb_budget = max(8, (budget_bytes // max(row_bytes, 1)) // 8 * 8)
    if b >= 512:
        tb_steps = max(8, (b // 8) // 8 * 8)      # aim for ~8 grid steps
    elif b >= 16:
        tb_steps = max(8, (b // 2) // 8 * 8)      # at least 2 grid steps
    else:
        tb_steps = 8
    return min(tb_budget, tb_steps)


def dialog_exchanger(contexts, ctx_lens, outputs, out_lens, status, state, turn_id):
    """Pallas equivalent of the prepare_batch packing + reward/decay math.

    contexts : (B, C, L) int32   already-integerized, per-turn padded utterances
    ctx_lens : (B, 1)  int32     number of valid turns per example
    outputs  : (B, Lo) int32     response tokens
    out_lens : (B, 1)  int32     valid response length per example
    status   : (B, 1)  int32     dialog status in {-1, 0, 1}
    state    : (B, S)  float32   state table (fill_in_state_dict values)
    turn_id  : (B, 1)  float32   elapsed turns (for gamma discounting)
    """
    B, C, L = contexts.shape
    Lo = outputs.shape[1]
    CL = C * L
    CLp = _round_up(CL, 128)       # lane-pad context region
    Lop = _round_up(Lo, 128)       # lane-pad output region
    W = CLp + Lop

    # VMEM-budget-derived block rows; pad B so the grid tiles exactly.
    row_bytes = 2 * (W * 4 + 2 * 4) + 2 * (W * 4)   # dbl-buffered in+sidecar+out
    TB = _pick_block_b(B, row_bytes)
    Bp = _round_up(max(B, TB), TB)

    # --- lane-dense merged token slab (wrapper-side layout plumbing) ---------
    ctx_flat = contexts.reshape(B, CL).astype(jnp.int32)
    tok = jnp.concatenate(
        [jnp.pad(ctx_flat, ((0, Bp - B), (0, CLp - CL))),
         jnp.pad(outputs.astype(jnp.int32), ((0, Bp - B), (0, Lop - Lo)))],
        axis=1)                                                   # (Bp, W)

    # Per-row packing thresholds, kept int32 (no f32 length round-trip).
    thr = jnp.concatenate(
        [ctx_lens.astype(jnp.int32) * L,          # flat context threshold
         out_lens.astype(jnp.int32) + CLp],       # output threshold in slab coords
        axis=1)                                                   # (B, 2)
    thr = jnp.pad(thr, ((0, Bp - B), (0, 0)))

    grid = (Bp // TB,)
    kernel = functools.partial(_pack_tokens_kernel, cl_pad=CLp)

    packed = pl.pallas_call(
        kernel,
        out_shape=jax.ShapeDtypeStruct((Bp, W), jnp.int32),
        grid=grid,
        in_specs=[pl.BlockSpec((TB, W), lambda i: (i, 0)),
                  pl.BlockSpec((TB, 2), lambda i: (i, 0))],
        out_specs=pl.BlockSpec((TB, W), lambda i: (i, 0)),
        # `tok` is a wrapper temporary, so aliasing costs no defensive copy and
        # never clobbers a caller-owned buffer.
        input_output_aliases={0: 0},
        compiler_params=pltpu.CompilerParams(
            dimension_semantics=("parallel",),          # v7x megacore split
            vmem_limit_bytes=32 * 1024 * 1024),
    )(tok, thr)

    # Unpack along 128-aligned boundaries.
    ctx_p = packed[:B, :CL].reshape(B, C, L)          # vec_ctx_utts
    out_p = packed[:B, CLp:CLp + Lo]                  # vec_out_utts

    # --- reward_function(dialog_status) & state-table gamma decay ------------
    # Tiny (B,1)/(B,S) elementwise work; plain jnp is cheaper than an extra
    # sub-128-lane kernel slab (perf review).  Integer comparison on status.
    reward = jnp.where(status == -1, jnp.float32(-0.1 * 40.0),
                       jnp.where(status == 1, jnp.float32(0.2 * 40.0),
                                 jnp.float32(-0.1))).astype(jnp.float32)
    state_p = state.astype(jnp.float32) * jnp.power(
        jnp.float32(GAMMA), turn_id.astype(jnp.float32))

    return ctx_p, out_p, reward, state_p


def _reference(contexts, ctx_lens, outputs, out_lens, status, state, turn_id):
    B, C, L = contexts.shape
    ctx_mask = jnp.arange(C)[None, :, None] < ctx_lens[:, :, None]
    ctx_p = jnp.where(ctx_mask, contexts, 0)
    out_mask = jnp.arange(outputs.shape[1])[None, :] < out_lens
    out_p = jnp.where(out_mask, outputs, 0)
    reward = jnp.where(status == -1, -4.0,
                       jnp.where(status == 1, 8.0, -0.1)).astype(jnp.float32)
    state_p = state * (GAMMA ** turn_id)
    return ctx_p, out_p, reward, state_p


if __name__ == "__main__":
    # Small shapes consistent with forward(): B dialogs-turns, C=backward_size
    # context turns, L=max_utt_len tokens per turn, S slots in the state table.
    B, C, L, Lo, S = 16, 4, 16, 16, 8
    VOCAB = 50

    key = jax.random.PRNGKey(0)
    k = jax.random.split(key, 8)

    contexts = jax.random.randint(k[0], (B, C, L), 1, VOCAB, dtype=jnp.int32)
    ctx_lens = jax.random.randint(k[1], (B, 1), 1, C + 1, dtype=jnp.int32)
    outputs = jax.random.randint(k[2], (B, Lo), 1, VOCAB, dtype=jnp.int32)
    out_lens = jax.random.randint(k[3], (B, 1), 1, Lo + 1, dtype=jnp.int32)
    status = jax.random.randint(k[4], (B, 1), -1, 2, dtype=jnp.int32)   # {-1,0,1}
    state = jax.random.uniform(k[5], (B, S), dtype=jnp.float32)
    turn_id = jax.random.randint(k[6], (B, 1), 0, 10).astype(jnp.float32) / 2.0

    res = dialog_exchanger(contexts, ctx_lens, outputs, out_lens, status, state, turn_id)
    res = jax.block_until_ready(res)

    ref = _reference(contexts, ctx_lens, outputs, out_lens, status, state, turn_id)
    assert jnp.array_equal(res[0], ref[0])                     # packed contexts
    assert jnp.array_equal(res[1], ref[1])                     # packed outputs
    assert jnp.allclose(res[2], ref[2], atol=1e-6)             # reward_ori
    assert jnp.allclose(res[3], ref[3], rtol=1e-5, atol=1e-6)  # decayed state

    print("KERNEL_OK")
</pallas_src>

<mosaic_0001>
module attributes {stable_mosaic.version = 11 : i64} {
  func.func @_pack_tokens_kernel(%arg0: i32, %arg1: memref<8x256xi32, #tpu.memory_space<vmem>>, %arg2: memref<8x2xi32, #tpu.memory_space<vmem>>, %arg3: memref<8x256xi32, #tpu.memory_space<vmem>>) attributes {dimension_semantics = [#tpu.dimension_semantics<parallel>], iteration_bounds = array<i64: 2>, scalar_prefetch = 0 : i64, scratch_operands = 0 : i64, tpu.core_type = #tpu.core_type<tc>, window_params = [{transform_indices = @transform_0, window_bounds = array<i64: 8, 256>}, {transform_indices = @transform_1, window_bounds = array<i64: 8, 2>}, {transform_indices = @transform_2, window_bounds = array<i64: 8, 256>}]} {
    %c0 = arith.constant 0 : index
    %c0_0 = arith.constant 0 : index
    %0 = vector.load %arg2[%c0, %c0_0] : memref<8x2xi32, #tpu.memory_space<vmem>>, vector<8x2xi32>
    %1 = vector.extract_strided_slice %0 {offsets = [0, 0], sizes = [8, 1], strides = [1, 1]} : vector<8x2xi32> to vector<8x1xi32>
    %2 = vector.extract_strided_slice %0 {offsets = [0, 1], sizes = [8, 1], strides = [1, 1]} : vector<8x2xi32> to vector<8x1xi32>
    %3 = tpu.iota {dimensions = array<i32: 1>} : vector<8x256xi32>
    %c128_i32 = arith.constant 128 : i32
    %4 = vector.broadcast %c128_i32 : i32 to vector<8x256xi32>
    %5 = arith.cmpi slt, %3, %4 : vector<8x256xi32>
    %6 = vector.shape_cast %1 : vector<8x1xi32> to vector<8x1xi32>
    %7 = vector.broadcast %6 : vector<8x1xi32> to vector<8x256xi32>
    %8 = vector.shape_cast %2 : vector<8x1xi32> to vector<8x1xi32>
    %9 = vector.broadcast %8 : vector<8x1xi32> to vector<8x256xi32>
    %10 = arith.select %5, %7, %9 : vector<8x256xi1>, vector<8x256xi32>
    %11 = arith.cmpi slt, %3, %10 : vector<8x256xi32>
    %c0_1 = arith.constant 0 : index
    %c0_2 = arith.constant 0 : index
    %12 = vector.load %arg1[%c0_1, %c0_2] : memref<8x256xi32, #tpu.memory_space<vmem>>, vector<8x256xi32>
    %c0_i32 = arith.constant 0 : i32
    %13 = vector.broadcast %c0_i32 : i32 to vector<8x256xi32>
    %14 = arith.select %11, %12, %13 : vector<8x256xi1>, vector<8x256xi32>
    %c0_3 = arith.constant 0 : index
    %c0_4 = arith.constant 0 : index
    %15 = vector.load %arg3[%c0_3, %c0_4] : memref<8x256xi32, #tpu.memory_space<vmem>>, vector<8x256xi32>
    tpu.vector_store %arg3[%c0_3, %c0_4], %14 {strides = array<i32>} : memref<8x256xi32, #tpu.memory_space<vmem>>, vector<8x256xi32>,
    return
  }
  func.func @transform_0(%arg0: i32) -> (i32, i32) {
    %c0_i32 = arith.constant 0 : i32
    %c0_i32_0 = arith.constant 0 : i32
    return %arg0, %c0_i32 : i32, i32
  }
  func.func @transform_1(%arg0: i32) -> (i32, i32) {
    %c0_i32 = arith.constant 0 : i32
    %c0_i32_0 = arith.constant 0 : i32
    return %arg0, %c0_i32 : i32, i32
  }
  func.func @transform_2(%arg0: i32) -> (i32, i32) {
    %c0_i32 = arith.constant 0 : i32
    %c0_i32_0 = arith.constant 0 : i32
    return %arg0, %c0_i32 : i32, i32
  }
}

</mosaic_0001>

<bundles_post_ra>
// kernel: tpu_custom_call.1
= control target key start
LH: loop header
LB: loop body
LE: loop exit
PB: predicated region body
PF: predicated region fallthrough
CT: control target
= control target key end

     0   :  { %7 = vsyncpa [#allocation3], 0  ;;  %s646_s0 = inlined_call_operand.hbm [shape: s32[16,256], index: 0, kind: input, shape index: {}, may-alias: {0,2}]   ;;  %s647_s1 = inlined_call_operand.vmem [shape: s32[16,2], index: 1, kind: input, shape index: {}]   ;;  %s648_s2 = inlined_call_operand.hbm [shape: s32[16,256], index: 2, kind: output, shape index: {}, may-alias: {0,2}]  }
   0x1   :  { %9 = vsyncpa [#allocation3 + $0x1], 0 }
   0x2   :  { %10 = vsyncpa [#allocation4], 0 }
   0x3   :  { %12 = vsyncpa [#allocation4 + $0x1], 0  ;;  %s480_s9 = smov 0   ;;  %s482_s10 = smov 0  }
   0x4   :  { %s484_s11 = smov 0   ;;  %s486_s12 = smov 0  }
   0x5 LB: > { %s501_s13 = sadd.s32 4294967295, %s459_s12   ;;  %s296_s14 = sadd.s32 4294967294, %s459_s12   ;;  %s459_s12 = sphi %s486_s12, %s663_s12   ;;  %s455_s11 = sphi %s484_s11, %s662_s11   ;;  %s451_s10 = sphi %s482_s10, %s661_s10   ;;  %s447_s9 = sphi %s480_s9, %s660_s9  }
   0x6   : > { %s505_s15 = sadd.s32 1, %s459_s12   ;;  %s25_s16 = sadd.s32 1, %s455_s11 }
   0x7   : > { %s22_s17 = ssub.s32 %s459_s12, %s505_s15  ;;  %p32_p0 = scmp.ne.s32.totalorder %s455_s11, %s451_s10 }
   0x8   : > { %p23_p1 = scmp.eq.s32.totalorder %s22_s17, 0  ;;  %p33_p2 = scmp.eq.s32.totalorder %s459_s12, 0 }
   0x9   : > { %p38_p3 = scmp.ne.s32.totalorder %s451_s10, %s447_s9  ;;  %p39_p4 = scmp.eq.s32.totalorder %s501_s13, 0 }
   0xa   : > { %s517_s18 = scalar_select %p23_p1, %s455_s11, %s25_s16  }
   0xb   : > { %p519_p5 = por %p33_p2, %p32_p0  ;;  %p523_p6 = por %p39_p4, %p38_p3 }
   0xc   : > { %p88_p7 = scmp.eq.s32.totalorder %s501_s13, 1  ;;  %p94_p8 = scmp.eq.s32.totalorder %s296_s14, 1 }
   0xd   : > { %p325_p10 = scmp.lt.s32.totalorder %s459_s12, 2  ;;  %s114_s23 = sand.u32 1, %s455_s11  }
   0xe   : > { %p530_p11 = por %p88_p7, %p32_p0  ;;  %p534_p12 = por %p94_p8, %p38_p3 }
   0xf   : > { %s311_s24 = sshll.u32 %s459_s12, 8  ;;  %s299_s25 = sshll.u32 %s114_s23, 4 }
  0x10   : > { %s652_s21 = scalar_select %p530_p11, 1, 0 }
  0x11   : > { %s653_s22 = scalar_select %p534_p12, 1, 0 }
  0x12   : > { %s543_s28 = scalar_lea.hbm %s646_s0, %s311_s24  ;;  %s118_s29 = scalar_lea.vmem [#allocation2], %s299_s25 }
  0x13   : > { %s126_s30 = sshll.u32 %s118_s29, 4  ;;  %p547_p13 = pnand %p325_p10, %p519_p5  ;;  %s551_s30 = int_to_ptr.vmem [resolvable:$true] %s126_s30 }
  0x14   : > { %s115_s4 = scalar_lea.sflag [#allocation3], %s114_s23  ;;  %s363_s5 = scalar_lea.hbm %s543_s28, 256 }
  0x15   : > { %p364_p2 = scmp.ne.s32.totalorder %s543_s28, %s363_s5  ;;  %p365_p3 = pneg %p547_p13 }
  0x16   : > { %s368_s8 = scalar_lea.hbm %s646_s0, 512  ;;  %p369_p5 = scmp.lt.u32.totalorder %s543_s28, %s646_s0 }
  0x17   : > { %p366_p4 = pnand %p365_p3, %p364_p2  ;;  %p370_p8 = scmp.lt.u32.totalorder %s368_s8, %s363_s5 }
  0x18   : > { %p372_p9 = scmp.lt.u32.totalorder %s363_s5, %s543_s28 }
  0x19   : > { %p367_p7 = pneg %p366_p4  ;;  %p371_p10 = por %p370_p8, %p369_p5 }
  0x1b   : > { %p373_p0 = por %p372_p9, %p371_p10 }
  0x1d   : > { %p374_p1 = pnand %p373_p0, %p367_p7 }
  0x1f   : > { %377 = shalt.err (!%p374_p1)
}
  0x20   : > { %s378_s17 = scalar_lea.vmem %s551_s30, 256  ;;  %s461_s19 = smov [#allocation2]  }
  0x21   : > { %p379_p2 = scmp.ne.s32.totalorder %s551_s30, %s378_s17  ;;  %s383_s23 = sshll.u32 %s461_s19, 4  ;;  %s384_s23 = int_to_ptr.vmem [resolvable:$false] %s383_s23 }
  0x22   : > { %s385_s24 = scalar_lea.vmem %s384_s23, 512  ;;  %p386_p11 = scmp.lt.s32.totalorder %s551_s30, %s384_s23 }
  0x23   : > { %p381_p4 = pnand %p379_p2, %p365_p3  ;;  %p387_p5 = scmp.lt.s32.totalorder %s385_s24, %s378_s17 }
  0x25   : > { %p382_p12 = pneg %p381_p4  ;;  %p388_p8 = por %p387_p5, %p386_p11 }
  0x27   : > { %p389_p9 = pnand %p388_p8, %p382_p12 }
  0x29   : > { %392 = shalt.err (!%p389_p9)
}
  0x2a   : > { %320 = dma.hbm_to_vmem [thread:$0]  (!%p547_p13), %s543_s28, 256, %s551_s30, %s115_s4  }
  0x2b   : > { %p655_p0 = scmp.lt.s32.totalorder %s459_s12, 3  ;;  %p656_p1 = scmp.ge.s32.totalorder %s459_s12, 1 }
  0x2d   : > { %p139_p3 = pnand %p656_p1, %p655_p0 }
  0x2e   : > { %s585_s25 = sand.u32 (!%p139_p3), 1, %s451_s10  }
  0x2f   : > { %142 = sbr.rel (%p139_p3) target bundleno = 211 (0xd3), region = 28  ;;  %s303_s26 = sshll.u32 (!%p139_p3), %s585_s25, 4 }
  0x30   : > { %s145_s27 = scalar_lea.sflag (!%p139_p3), [#allocation3], %s585_s25  ;;  %s148_s29 = scalar_lea.vmem (!%p139_p3), [#allocation2], %s303_s26 }
  0x36   : > { %438 = dma.done.wait (%p523_p6), %s145_s27, 256  }
  0x37   : > { %440 = vsyncadd (%p523_p6), %s145_s27, 4294967040  ;;  %p173_p11 = scmp.lt.s32.totalorder %s501_s13, 1  ;;  %v462_v0 = vmov 0   ;;  %v463_v2 = vmov 1   ;;  %v178_v3 = vlaneseq  ;;  %v193_v5 = vld [vmem:[%s148_s29] sm:$0xff]  ;;  %s172_s20 = scalar_lea.vmem [#allocation5], %s303_s26 }
  0x38   : > { %361 = vset.pattern.permute.xlu0 %v462_v0  ;;  %s214_s6 = sshll.u32 %s172_s20, 4  ;;  %s312_s7 = sshll.u32 %s501_s13, 8  ;;  %v194_v9 = vld [vmem:[%s148_s29 + $0x8] sm:$0xff]  ;;  %s604_s6 = int_to_ptr.vmem [resolvable:$true] %s214_s6 }
  0x39   : > { %s174_s28 = scalar_select %p173_p11, %s501_s13, 1  ;;  %v179_v4 = vand.u32 127, %v178_v3 }
  0x3a   : > { %s602_s16 = scalar_lea.hbm %s648_s2, %s312_s7  ;;  %s200_s17 = scalar_lea.sflag [#allocation4], %s585_s25 }
  0x3b   : > { %s305_s30 = sshll.u32 %s174_s28, 3  ;;  %v180_v8 = vadd.s32 128, %v179_v4  ;;  %s393_s19 = scalar_lea.vmem %s604_s6, 256 }
  0x3c   : > { %s176_s5 = scalar_lea.vmem %s647_s1, %s305_s30  ;;  %p394_p6 = scmp.ne.s32.totalorder %s604_s6, %s393_s19 }
  0x3d   : > { %v177_v1 = vld [vmem:[%s176_s5] sm:$0xff]  ;;  %p657_p12 = scmp.ne.s32.totalorder %s652_s21, 0  ;;  %s464_s13 = smov [#allocation5]  }
  0x3e   : > { %184 = vperm.xlu0 %361, %v177_v1   ;;  %s397_s23 = sshll.u32 %s464_s13, 4  ;;  %s398_s23 = int_to_ptr.vmem [resolvable:$false] %s397_s23 }
  0x3f   : > { %p395_p13 = pnand %p394_p6, %p657_p12  ;;  %s399_s24 = scalar_lea.vmem %s398_s23, 512 }
  0x40   : > { %p400_p10 = scmp.lt.s32.totalorder %s604_s6, %s398_s23  ;;  %p401_p2 = scmp.lt.s32.totalorder %s399_s24, %s393_s19 }
  0x41   : > { %p396_p7 = pneg %p395_p13 }
  0x42   : > { %362 = vset.pattern.permute.xlu0 %v463_v2  ;;  %p402_p4 = por %p401_p2, %p400_p10 }
  0x43   : > { %187 = vperm.xlu0 %362, %v177_v1  }
  0x44   : > { %p403_p5 = pnand %p402_p4, %p396_p7 }
  0xbd   : > { %v185_v6 = vpop.permute.xlu0 %184 }
  0xbe   : > { %vm191_vm0 = vcmp.lt.s32.totalorder %v179_v4, %v185_v6 }
  0xbf   : > { %v195_v7 = vsel %vm191_vm0, %v193_v5, 0 }
  0xc0   : > { %197 = vst [vmem:[%s172_s20] sm:$0xff] %v195_v7 }
  0xc2   : > { %v188_v10 = vpop.permute.xlu0 %187 }
  0xc3   : > { %vm192_vm1 = vcmp.lt.s32.totalorder %v180_v8, %v188_v10 }
  0xc4   : > { %v196_v11 = vsel %vm192_vm1, %v194_v9, 0 }
  0xc5   : > { %198 = vst [vmem:[%s172_s20 + $0x8] sm:$0xff] %v196_v11 }
  0xc6   : > { %406 = shalt.err (!%p403_p5)
}
  0xc7   : > { %s407_s25 = scalar_lea.hbm %s602_s16, 256  ;;  %s411_s29 = scalar_lea.hbm %s648_s2, 512 }
  0xc8   : > { %p408_p8 = scmp.ne.s32.totalorder %s602_s16, %s407_s25  ;;  %p412_p1 = scmp.lt.u32.totalorder %s602_s16, %s648_s2 }
  0xc9   : > { %p413_p3 = scmp.lt.u32.totalorder %s411_s29, %s407_s25  ;;  %p415_p6 = scmp.lt.u32.totalorder %s407_s25, %s602_s16 }
  0xca   : > { %p409_p9 = pnand %p408_p8, %p657_p12 }
  0xcb   : > { %p414_p11 = por %p413_p3, %p412_p1 }
  0xcc   : > { %p410_p0 = pneg %p409_p9 }
  0xcd   : > { %p416_p13 = por %p415_p6, %p414_p11 }
  0xcf   : > { %p417_p7 = pnand %p416_p13, %p410_p0 }
  0xd1   : > { %420 = shalt.err (!%p417_p7)
}
  0xd2   : > { %315 = dma.vmem_to_hbm [thread:$0]  (%p657_p12), %s604_s6, 256, %s602_s16, %s200_s17  }
  0xd3 PF: > { %s226_s3 = sand.u32 1, %s447_s9   ;;  %p658_p10 = scmp.ne.s32.totalorder %s653_s22, 0 }
  0xd4   : > { %p659_p2 = scmp.ge.s32.totalorder %s459_s12, 2  ;;  %s227_s4 = scalar_lea.sflag [#allocation4], %s226_s3 }
  0xd6   : > { %p322_p4 = pnand %p659_p2, %p658_p10 }
  0xd8   : > { %442 = dma.done.wait (!%p322_p4), %s227_s4, 256  }
  0xd9   : > { %444 = vsyncadd (!%p322_p4), %s227_s4, 4294967040  ;;  %p15_p5 = scmp.ge.s32.totalorder %s505_s15, 4   ;;  %s660_s9 = smov %s451_s10 }
  0xda   : > { %s661_s10 = smov %s455_s11  ;;  %s662_s11 = smov %s517_s18 }
  0xdb   : > { %s663_s12 = smov %s505_s15  ;;  %17 = sbr.rel (!%p15_p5) target bundleno = 5 (0x5), region = 76 }
  0xe2   :  { %232 = vsyncpa [#allocation3], 1 }
  0xe3   :  { %234 = vsyncpa [#allocation3 + $0x1], 1 }
  0xe4   :  { %235 = vsyncpa [#allocation4], 1 }
  0xe5   :  { %237 = vsyncpa [#allocation4 + $0x1], 1 }

</bundles_post_ra>
